<compile_context>
chip_gen: v5e
topology: v5e:2x2
jax: 0.10.0
libtpu: 0.0.40
codegen_flags: <defaults>
</compile_context>

<pallas_src>
import functools

import jax
import jax.numpy as jnp
from jax import lax
from jax.experimental import pallas as pl
from jax.experimental.pallas import tpu as pltpu


def _tpu_profile():
    """Per-generation (target A bytes per grid step, vmem limit, min grid steps)."""
    kind = ""
    try:
        dev = jax.devices()[0]
        if dev.platform == "tpu":
            kind = dev.device_kind.lower()
    except Exception:
        pass
    if "v7" in kind:
        # v7x: 64 MiB physical VMEM (32 MiB default scoped), 2 TensorCores/chip:
        # smaller tiles and >= 2 grid steps per core so each core double-buffers.
        return 12 << 20, 48 << 20, 4
    if "v6" in kind or "v5e" in kind or "v5 lite" in kind or "v5lite" in kind:
        # v5e / v6e: 128 MiB physical VMEM, single TensorCore: few, large steps.
        return 24 << 20, 96 << 20, 1
    # Unknown generation (v4 / v5p / interpret): conservative sizes, assume 2 cores.
    return 8 << 20, 32 << 20, 4


def _harden_tile(tile, batch):
    """Clamp/round a batch tile so blocks and the inner chunk stay well-formed."""
    tile = max(1, min(int(tile), batch))
    if tile != batch and tile >= 8:
        tile = (tile // 8) * 8  # keep the chunk loop at full sublane width
    return tile


def _choose_batch_tile(batch, d, itemsize, target_bytes, min_steps):
    """Rows of A per grid step: byte-based, no hard row cap."""
    per_row = max(1, d * d * itemsize)          # bytes of A per batch row
    tile = max(1, target_bytes // per_row)
    if min_steps > 1:                           # multi-TC chips: >= 2 steps per core
        tile = min(tile, max(1, pl.cdiv(batch, min_steps)))
    return _harden_tile(tile, batch)


def _choose_chunk(tile):
    """Batches processed per inner-loop iteration (full sublane width when possible)."""
    for c in (16, 8):
        if tile % c == 0:
            return c
    return tile


def _quadratic_kernel(a_ref, x_ref, o_ref, *, chunk_rows):
    """One grid step: (TB, D, D) tile of A -> (TB, 1, D) tile of the output.

    out[b, 0, i] = x[i] * sum_j A[b, i, j] * x[j]
    """
    d = a_ref.shape[-1]
    tb = a_ref.shape[0]
    n_chunks = tb // chunk_rows

    x = x_ref[...]                                          # (1, 1, D) f32
    # MXU LHS: x replicated to a full 8-row sublane so every per-batch matmul is
    # a native (8, D) x (D, D)^T shape.  Hoisted out of the loop (JAX does not
    # CSE broadcasts).  Cast to A's dtype so bf16 A runs bf16 x bf16 on the MXU;
    # accumulation stays f32 via preferred_element_type below.
    x_lhs = jnp.broadcast_to(x, (chunk_rows, 8, d)).astype(a_ref.dtype)

    def body(c, carry):
        r0 = pl.multiple_of(c * chunk_rows, chunk_rows)
        a_chunk = a_ref[pl.ds(r0, chunk_rows), :, :]        # (chunk, D, D)
        # y[b, m, i] = sum_j x[j] * A[b, i, j]  -- batched MXU mat-vec, f32 acc.
        y = lax.dot_general(
            x_lhs, a_chunk,
            dimension_numbers=(((2,), (2,)), ((0,), (0,))),
            preferred_element_type=jnp.float32,
        )                                                   # (chunk, 8, D)
        # Rows 0..7 are identical; keep row 0, apply the x[i] scale and store
        # lane-dense (last dim D) with no relayout of the MXU result.
        o_ref[pl.ds(r0, chunk_rows), :, :] = (x * y[:, :1, :]).astype(o_ref.dtype)
        return carry

    # fori_loop (not a static Python for) keeps live values bounded to one chunk.
    lax.fori_loop(0, n_chunks, body, 0, unroll=False)


def quadratic_forward(A, x_param, *, batch_tile=None, vmem_limit_bytes=None):
    """A: (B, D, D) f32/bf16, x_param: (D, 1) f32 -> (B, D) f32."""
    B, D, D2 = A.shape
    assert D == D2, "A must be (batch, in_channels, in_channels)"
    assert x_param.shape == (D, 1)

    target_bytes, default_vmem, min_steps = _tpu_profile()
    if vmem_limit_bytes is None:
        vmem_limit_bytes = default_vmem

    itemsize = jnp.dtype(A.dtype).itemsize
    if batch_tile is None:
        batch_tile = _choose_batch_tile(B, D, itemsize, target_bytes, min_steps)
    else:
        batch_tile = _harden_tile(batch_tile, B)   # harden user-supplied tiles
    chunk_rows = _choose_chunk(batch_tile)

    # Lane-dense parameter slab; kept f32 for the final x[i] scale.
    x3 = x_param.reshape(1, 1, D).astype(jnp.float32)

    # Last grid step may be padded when B % batch_tile != 0: the padded rows are
    # computed on garbage and discarded by Pallas (benign by construction).
    grid = (pl.cdiv(B, batch_tile),)

    # Advisory cost: 2 FLOPs per A element + final scale; bytes dominated by A.
    cost = pl.CostEstimate(
        flops=2 * B * D * D + B * D,
        transcendentals=0,
        bytes_accessed=B * D * D * itemsize + B * D * 4 + D * 4,
    )

    kernel = functools.partial(_quadratic_kernel, chunk_rows=chunk_rows)

    out3 = pl.pallas_call(
        kernel,
        out_shape=jax.ShapeDtypeStruct((B, 1, D), jnp.float32),
        grid_spec=pltpu.PrefetchScalarGridSpec(
            num_scalar_prefetch=0,
            grid=grid,
            in_specs=[
                pl.BlockSpec((batch_tile, D, D), lambda b: (b, 0, 0)),
                pl.BlockSpec((1, 1, D), lambda b: (0, 0, 0)),
            ],
            out_specs=pl.BlockSpec((batch_tile, 1, D), lambda b: (b, 0, 0)),
        ),
        compiler_params=pltpu.CompilerParams(
            dimension_semantics=("parallel",),
            vmem_limit_bytes=vmem_limit_bytes,
        ),
        cost_estimate=cost,
        # If a bundle dump on v7x still shows exposed DMA at small tiles, the A
        # BlockSpec can be given pipeline_mode=pl.Buffered(3); not enabled by
        # default since it is a measured, marginal (~few %) lever.
    )(A, x3)

    # Free reshape of the contiguous (B, 1, D) HBM slab back to (B, D).
    return out3.reshape(B, D)


if __name__ == "__main__":
    # Deterministic, small setup (mirrors QuadraticModel.__init__: x ~ U(-10, 10),
    # shape (in_channels, 1); class_num is unused by the module's forward).
    in_channels = 16
    class_num = 2
    batch = 8

    key = jax.random.PRNGKey(0)
    k_param, k_a = jax.random.split(key)
    x_param = jax.random.uniform(
        k_param, (in_channels, 1), minval=-10.0, maxval=10.0, dtype=jnp.float32
    )
    A = jax.random.normal(k_a, (batch, in_channels, in_channels), dtype=jnp.float32)

    out = quadratic_forward(A, x_param)
    out = jax.block_until_ready(out)

    # Plain-JAX reference of the PyTorch semantics.
    ref = jnp.sum(x_param * jnp.matmul(A, x_param), axis=-1)  # (B, D)
    assert out.shape == ref.shape == (batch, in_channels)
    # MXU f32 matmuls may be emulated with bf16 passes on some toolchains, so use
    # a scale-relative error bound rather than tight elementwise rtol; a wrong
    # kernel would be off by O(1), not O(1e-2).
    err = float(jnp.max(jnp.abs(out - ref)))
    scale = float(jnp.max(jnp.abs(ref))) + 1e-6
    assert err / scale < 3e-2, f"mismatch vs reference: rel_err={err / scale}"

    print("KERNEL_OK")
</pallas_src>

<mosaic_0001>
module attributes {stable_mosaic.version = 11 : i64} {
  func.func @_quadratic_kernel(%arg0: i32, %arg1: memref<2x16x16xf32, #tpu.memory_space<vmem>>, %arg2: memref<1x1x16xf32, #tpu.memory_space<vmem>>, %arg3: memref<2x1x16xf32, #tpu.memory_space<vmem>>) attributes {dimension_semantics = [#tpu.dimension_semantics<parallel>], iteration_bounds = array<i64: 4>, scalar_prefetch = 0 : i64, scratch_operands = 0 : i64, tpu.core_type = #tpu.core_type<tc>, window_params = [{transform_indices = @transform_0, window_bounds = array<i64: 2, 16, 16>}, {pipeline_mode = #tpu.pipeline_mode<synchronous>, transform_indices = @transform_1, window_bounds = array<i64: 1, 1, 16>}, {transform_indices = @transform_2, window_bounds = array<i64: 2, 1, 16>}]} {
    %c0 = arith.constant 0 : index
    %c0_0 = arith.constant 0 : index
    %c0_1 = arith.constant 0 : index
    %0 = vector.load %arg2[%c0, %c0_0, %c0_1] : memref<1x1x16xf32, #tpu.memory_space<vmem>>, vector<1x1x16xf32>
    %1 = vector.shape_cast %0 : vector<1x1x16xf32> to vector<1x1x16xf32>
    %2 = vector.broadcast %1 : vector<1x1x16xf32> to vector<2x8x16xf32>
    %c0_i32 = arith.constant 0 : i32
    %c2_i32 = arith.constant 2 : i32
    %3 = arith.muli %c0_i32, %c2_i32 : i32
    %4 = tpu.assume_multiple %3, 2 : i32
    %5 = arith.index_cast %4 : i32 to index
    %c0_2 = arith.constant 0 : index
    %c0_3 = arith.constant 0 : index
    %6 = vector.load %arg1[%5, %c0_2, %c0_3] : memref<2x16x16xf32, #tpu.memory_space<vmem>>, vector<2x16x16xf32>
    %cst = arith.constant dense<0.000000e+00> : vector<2x8x16xf32>
    %7 = tpu.matmul %2, %6, %cst {dimension_numbers = #tpu.dot_dimension_numbers<[2], [2], [1], [1], [0, 0, 0, 1, 1, 1], [0], [0]>} : vector<2x8x16xf32>, vector<2x16x16xf32>, vector<2x8x16xf32> -> vector<2x8x16xf32>
    %8 = vector.extract_strided_slice %7 {offsets = [0, 0, 0], sizes = [2, 1, 16], strides = [1, 1, 1]} : vector<2x8x16xf32> to vector<2x1x16xf32>
    %9 = vector.broadcast %0 : vector<1x1x16xf32> to vector<2x1x16xf32>
    %10 = arith.mulf %9, %8 : vector<2x1x16xf32>
    %11 = arith.index_cast %4 : i32 to index
    %c0_4 = arith.constant 0 : index
    %c0_5 = arith.constant 0 : index
    %12 = vector.load %arg3[%11, %c0_4, %c0_5] : memref<2x1x16xf32, #tpu.memory_space<vmem>>, vector<2x1x16xf32>
    tpu.vector_store %arg3[%11, %c0_4, %c0_5], %10 {strides = array<i32>} : memref<2x1x16xf32, #tpu.memory_space<vmem>>, vector<2x1x16xf32>,
    %c1_i32 = arith.constant 1 : i32
    return
  }
  func.func @transform_0(%arg0: i32) -> (i32, i32, i32) {
    %c0_i32 = arith.constant 0 : i32
    %c0_i32_0 = arith.constant 0 : i32
    %c0_i32_1 = arith.constant 0 : i32
    return %arg0, %c0_i32, %c0_i32_0 : i32, i32, i32
  }
  func.func @transform_1(%arg0: i32) -> (i32, i32, i32) {
    %c0_i32 = arith.constant 0 : i32
    %c0_i32_0 = arith.constant 0 : i32
    %c0_i32_1 = arith.constant 0 : i32
    %c0_i32_2 = arith.constant 0 : i32
    return %c0_i32, %c0_i32_0, %c0_i32_1 : i32, i32, i32
  }
  func.func @transform_2(%arg0: i32) -> (i32, i32, i32) {
    %c0_i32 = arith.constant 0 : i32
    %c0_i32_0 = arith.constant 0 : i32
    %c0_i32_1 = arith.constant 0 : i32
    return %arg0, %c0_i32, %c0_i32_0 : i32, i32, i32
  }
}

</mosaic_0001>

<bundles_post_ra>
// kernel: tpu_custom_call.1
= control target key start
LH: loop header
LB: loop body
LE: loop exit
PB: predicated region body
PF: predicated region fallthrough
CT: control target
= control target key end

     0   :  { %7 = vsyncpa [#allocation3], 0  ;;  %s728_s0 = inlined_call_operand.hbm [shape: f32[8,16,16], index: 0, kind: input, shape index: {}]   ;;  %s729_s1 = inlined_call_operand.hbm [shape: f32[1,1,16], index: 1, kind: input, shape index: {}]   ;;  %s730_s2 = inlined_call_operand.hbm [shape: f32[8,1,16], index: 2, kind: output, shape index: {}]  }
   0x1   :  { %9 = vsyncpa [#allocation3 + $0x1], 0 }
   0x2   :  { %10 = vsyncpa [#allocation6], 0 }
   0x3   :  { %11 = vsyncpa [#allocation4], 0 }
   0x4   :  { %13 = vsyncpa [#allocation4 + $0x1], 0  ;;  %s587_s9 = smov 0   ;;  %s589_s10 = smov 0  }
   0x5   :  { %s591_s11 = smov 0   ;;  %s593_s12 = smov 0  }
   0x6 LB: > { %s608_s13 = sadd.s32 4294967295, %s565_s12   ;;  %s349_s14 = sadd.s32 4294967294, %s565_s12   ;;  %s565_s12 = sphi %s593_s12, %s740_s12   ;;  %s561_s11 = sphi %s591_s11, %s739_s11   ;;  %s557_s10 = sphi %s589_s10, %s738_s10   ;;  %s553_s9 = sphi %s587_s9, %s737_s9  }
   0x7   : > { %s612_s15 = sadd.s32 1, %s565_s12   ;;  %s26_s16 = sadd.s32 1, %s561_s11 }
   0x8   : > { %s23_s17 = ssub.s32 %s565_s12, %s612_s15  ;;  %p33_p0 = scmp.ne.s32.totalorder %s561_s11, %s557_s10 }
   0x9   : > { %p24_p1 = scmp.eq.s32.totalorder %s23_s17, 0  ;;  %p34_p2 = scmp.eq.s32.totalorder %s565_s12, 0 }
   0xa   : > { %p39_p3 = scmp.ne.s32.totalorder %s557_s10, %s553_s9  ;;  %p40_p4 = scmp.eq.s32.totalorder %s608_s13, 0 }
   0xb   : > { %s624_s18 = scalar_select %p24_p1, %s561_s11, %s26_s16  }
   0xc   : > { %p626_p5 = por %p34_p2, %p33_p0  ;;  %p632_p6 = por %p40_p4, %p39_p3 }
   0xd   : > { %p84_p7 = scmp.eq.s32.totalorder %s608_s13, 3  ;;  %p90_p8 = scmp.eq.s32.totalorder %s349_s14, 3 }
   0xe   : > { %p350_p9 = scmp.ge.s32.totalorder %s565_s12, 1  ;;  %p97_p10 = scmp.lt.s32.totalorder %s565_s12, 5 }
   0xf   : > { %p639_p11 = por %p84_p7, %p33_p0  ;;  %p643_p12 = por %p90_p8, %p39_p3 }
  0x10   : > { %p647_p13 = pnand %p350_p9, %p97_p10  ;;  %s109_s26 = sshll.u32 %s729_s1, 4  ;;  %s110_s26 = int_to_ptr.hbm [resolvable:$true] %s109_s26 }
  0x11   : > { %s567_s27 = smov [#allocation5]   ;;  %p394_p2 = scmp.lt.s32.totalorder %s565_s12, 4 }
  0x12   : > { %p381_p1 = pneg %p647_p13  ;;  %s111_s28 = sshll.u32 %s567_s27, 4  ;;  %s112_s28 = int_to_ptr.vmem [resolvable:$true] %s111_s28 }
  0x13   : > { %s122_s29 = sand.u32 1, %s561_s11   ;;  %p662_p3 = pnand %p394_p2, %p626_p5 }
  0x14   : > { %p382_p0 = pnand %p381_p1, %p40_p4  ;;  %s353_s3 = sshll.u32 %s122_s29, 5 }
  0x15   : > { %s372_s4 = sshll.u32 %s565_s12, 5  ;;  %s126_s14 = scalar_lea.vmem [#allocation2], %s353_s3 }
  0x16   : > { %384 = dma.hbm_to_vmem [thread:$0]  (!%p382_p0), %s110_s26, 16, %s112_s28, [#allocation6]  }
  0x17   : > { %s132_s7 = scalar_lea.hbm %s728_s0, %s372_s4  ;;  %s135_s16 = sshll.u32 %s126_s14, 4  ;;  %s136_s16 = int_to_ptr.vmem [resolvable:$true] %s135_s16 }
  0x18   : > { %s133_s8 = sshll.u32 %s132_s7, 4  ;;  %s123_s17 = scalar_lea.sflag [#allocation3], %s122_s29  ;;  %s134_s8 = int_to_ptr.hbm [resolvable:$true] %s133_s8 }
  0x19   : > { %s465_s24 = sshra.s32 %s134_s8, 4  ;;  %p469_p7 = pneg %p662_p3  ;;  %s466_s24 = int_to_ptr.hbm [resolvable:$true] %s465_s24 }
  0x1a   : > { %s467_s19 = scalar_lea.hbm %s466_s24, 32  ;;  %s472_s27 = scalar_lea.hbm %s728_s0, 128 }
  0x1b   : > { %p468_p5 = scmp.ne.s32.totalorder %s466_s24, %s467_s19  ;;  %p473_p10 = scmp.lt.s32.totalorder %s466_s24, %s728_s0 }
  0x1c   : > { %p474_p1 = scmp.lt.s32.totalorder %s472_s27, %s467_s19 }
  0x1d   : > { %p470_p8 = pnand %p469_p7, %p468_p5 }
  0x1e   : > { %p475_p0 = por %p474_p1, %p473_p10 }
  0x1f   : > { %p471_p9 = pneg %p470_p8 }
  0x21   : > { %p476_p2 = pnand %p475_p0, %p471_p9 }
  0x23   : > { %479 = shalt.err (!%p476_p2)
}
  0x24   : > { %s568_s29 = smov 128   ;;  %s569_s3 = smov 8  }
  0x25   : > { %388 = dma.hbm_to_vmem [thread:$0]  (!%p662_p3), %s134_s8, 512, %s136_s16, %s123_s17, %s568_s29, %s568_s29, %s569_s3  }
  0x26   : > { %147 = sbr.rel (%p647_p13) target bundleno = 187 (0xbb), region = 28  ;;  %s683_s5 = sand.u32 (!%p647_p13), 1, %s557_s10  }
  0x27   : > { %s358_s6 = sshll.u32 (!%p647_p13), %s683_s5, 5  ;;  %s150_s7 = scalar_lea.sflag (!%p647_p13), [#allocation3], %s683_s5 }
  0x28   : > { %s153_s14 = scalar_lea.vmem (!%p647_p13), [#allocation2], %s358_s6 }
  0x2b   : > { %540 = dma.done.wait (%p632_p6), %s150_s7, 512  }
  0x2c   : > { %542 = vsyncadd (%p632_p6), %s150_s7, 4294966784 }
  0x2d   : > { %544 = dma.done.wait (%p40_p4), [#allocation6], 16  }
  0x2e   : > { %546 = vsyncadd (%p40_p4), [#allocation6], 4294967280  ;;  %vm191_vm0 = vcmask 130048   ;;  %v188_v0 = vld [vmem:[%s153_s14 + $0x8] sm:$0xff]  ;;  %v190_v1 = vld [vmem:[%s153_s14 + $0x18] sm:$0xff]  ;;  %s360_s20 = sshll.u32 %s683_s5, 1 }
  0x2f   : > { %361 = vmatpush.xpose.msk.msra.mxu0 %vm191_vm0, %v188_v0  ;;  %364 = vmatpush.xpose.msk.msra.mxu1 %vm191_vm0, %v190_v1  ;;  %v187_v2 = vld [vmem:[%s153_s14] sm:$0xff]  ;;  %v189_v3 = vld [vmem:[%s153_s14 + $0x10] sm:$0xff]  ;;  %s368_s23 = sshll.u32 %s608_s13, 1  ;;  %s179_s17 = scalar_lea.vmem [#allocation7], %s360_s20  ;;  %vm248_vm1 = vcmask 122880  }
  0x30   : > { %v434_v4 = vld [vmem:[#allocation5] ss:$0 sm:$0xff]  ;;  %s262_s16 = scalar_lea.hbm %s730_s2, %s368_s23  ;;  %s263_s24 = sshll.u32 %s179_s17, 4  ;;  %s264_s24 = int_to_ptr.vmem [resolvable:$true] %s263_s24 }
  0x31   : > { %v182_v5 = vld [vmem:[#allocation5] sm:$0x1]  ;;  %s265_s19 = sshll.u32 %s262_s16, 4  ;;  %s252_s25 = scalar_lea.sflag [#allocation4], %s683_s5  ;;  %s266_s19 = int_to_ptr.hbm [resolvable:$true] %s265_s19 }
  0x32   : > { %s509_s13 = sshra.s32 %s266_s19, 4  ;;  %s515_s4 = scalar_lea.hbm %s730_s2, 8  ;;  %s510_s13 = int_to_ptr.hbm [resolvable:$true] %s509_s13 }
  0x33   : > { %362 = vmatpush.xpose.msk.msra.mxu0 %vm191_vm0, %v187_v2  ;;  %365 = vmatpush.xpose.msk.msra.mxu1 %vm191_vm0, %v189_v3  ;;  %s511_s26 = scalar_lea.hbm %s510_s13, 2  ;;  %p516_p3 = scmp.lt.s32.totalorder %s510_s13, %s730_s2 }
  0x34   : > { %p512_p4 = scmp.ne.s32.totalorder %s510_s13, %s511_s26  ;;  %p517_p5 = scmp.lt.s32.totalorder %s515_s4, %s511_s26 }
  0x36   : > { %363 = vmatmul.msk.f32.vlgmr.msra.gmra.mxu0 %vm191_vm0, %v434_v4  ;;  %366 = vmatmul.msk.f32.vlgmr.msra.gmra.mxu1 %vm191_vm0, %v434_v4  ;;  %p513_p6 = pnand %p512_p4, %p639_p11  ;;  %p518_p7 = por %p517_p5, %p516_p3 }
  0x38   : > { %p514_p13 = pneg %p513_p6 }
  0x3a   : > { %p519_p8 = pnand %p518_p7, %p514_p13 }
  0xb3   : > { %v217_v6 = vpop.f32.mrf.mxu0  ;;  %v243_v7 = vpop.f32.mrf.mxu1 }
  0xb4   : > { %v246_v8 = vmul.f32 %v217_v6, %v182_v5  ;;  %v247_v9 = vmul.f32 %v243_v7, %v182_v5 }
  0xb6   : > { %249 = vst.msk [vmem:[%s179_s17] sm:$0x1] %vm248_vm1, %v246_v8 }
  0xb7   : > { %250 = vst.msk [vmem:[%s179_s17 + $0x1] sm:$0x1] %vm248_vm1, %v247_v9 }
  0xb8   : > { %522 = shalt.err (!%p519_p8)
}
  0xb9   : > { %s570_s5 = smov 16   ;;  %s571_s6 = smov 1  }
  0xba   : > { %379 = dma.vmem_to_hbm [thread:$0]  (%p639_p11), %s264_s24, 32, %s266_s19, %s252_s25, %s570_s5, %s570_s5, %s571_s6  }
  0xbb PF: > { %p396_p9 = scmp.ge.s32.totalorder %s565_s12, 2  ;;  %s280_s7 = sand.u32 1, %s553_s9  }
  0xbc   : > { %s281_s14 = scalar_lea.sflag [#allocation4], %s280_s7 }
  0xbd   : > { %p390_p10 = pnand %p396_p9, %p643_p12 }
  0xbf   : > { %p391_p1 = pneg %p390_p10 }
  0xc1   : > { %548 = dma.done.wait (%p391_p1), %s281_s14, 32  }
  0xc2   : > { %550 = vsyncadd (%p391_p1), %s281_s14, 4294967264  ;;  %p16_p0 = scmp.ge.s32.totalorder %s612_s15, 6   ;;  %s737_s9 = smov %s557_s10 }
  0xc3   : > { %s738_s10 = smov %s561_s11  ;;  %s739_s11 = smov %s624_s18 }
  0xc4   : > { %s740_s12 = smov %s612_s15  ;;  %18 = sbr.rel (!%p16_p0) target bundleno = 6 (0x6), region = 78 }
  0xc9   :  { %287 = vsyncpa [#allocation3], 1 }
  0xca   :  { %289 = vsyncpa [#allocation3 + $0x1], 1 }
  0xcb   :  { %290 = vsyncpa [#allocation6], 1 }
  0xcc   :  { %291 = vsyncpa [#allocation4], 1 }
  0xcd   :  { %293 = vsyncpa [#allocation4 + $0x1], 1 }

</bundles_post_ra>
